<compile_context>
chip_gen: v5e
topology: v5e:2x2
jax: 0.10.0
libtpu: 0.0.40
codegen_flags: <defaults>
</compile_context>

<pallas_src>
import math

import jax
import jax.numpy as jnp
from jax.experimental import pallas as pl
from jax.experimental.pallas import tpu as pltpu


# ------------------------------ small helpers ------------------------------ #
def _round_up(x, m):
    return ((x + m - 1) // m) * m


def _block_bytes(lead, rows, cols, dtype):
    """Padded VMEM bytes of a block whose trailing two dims are (rows, cols)."""
    isz = jnp.dtype(dtype).itemsize
    sub = max(8, 32 // isz)                       # 8 rows f32, 16 bf16, 32 i8
    return lead * _round_up(rows, sub) * _round_up(cols, 128) * isz


def _vmem_budget():
    """Per-generation VMEM budget (~75% of physical: ~48MiB v7x, ~96MiB v5e/v6e)."""
    cap = 64 << 20
    try:
        cap = int(pltpu.get_tpu_info().vmem_capacity_bytes)
    except Exception:
        pass
    return max(32 << 20, (cap * 3) // 4)


# ------------------------------ linear kernel ------------------------------ #
def _linear_kernel(x_ref, wt_ref, b_ref, o_ref):
    # y = x @ W^T + b   (wt_ref already holds W^T in the compute dtype)
    y = jnp.dot(x_ref[...], wt_ref[...], preferred_element_type=jnp.float32)
    o_ref[...] = (y + b_ref[...]).astype(o_ref.dtype)


def pallas_linear(x2d, wt, b, out_dtype=jnp.float32):
    """x2d: (N, d_in); wt: (d_in, d_out) = W^T; b: (d_out,) f32."""
    n, d_in = x2d.shape
    d_out = wt.shape[1]
    x2d = x2d.astype(wt.dtype)
    # Row tiling: >=256-row blocks (pad if needed) so the MXU M dim stays full
    # and per-grid-step overhead is amortized; small inputs run as one block.
    tm = 256
    if n <= tm:
        tm, n_pad = n, n
    else:
        n_pad = _round_up(n, tm)
        if n_pad != n:
            x2d = jnp.pad(x2d, ((0, n_pad - n), (0, 0)))
    # TODO(synk): add K/N tiling of the weight once d_model grows beyond a few
    # thousand (weights are kept fully VMEM-resident here).
    out = pl.pallas_call(
        _linear_kernel,
        grid=(n_pad // tm,),
        in_specs=[
            pl.BlockSpec((tm, d_in), lambda i: (i, 0)),
            pl.BlockSpec((d_in, d_out), lambda i: (0, 0)),   # resident weights
            pl.BlockSpec((1, d_out), lambda i: (0, 0)),
        ],
        out_specs=pl.BlockSpec((tm, d_out), lambda i: (i, 0)),
        out_shape=jax.ShapeDtypeStruct((n_pad, d_out), out_dtype),
        compiler_params=pltpu.CompilerParams(
            dimension_semantics=("parallel",)),
    )(x2d, wt, b.reshape(1, d_out).astype(jnp.float32))
    return out[:n] if n_pad != n else out


# ----------------------------- attention kernel ----------------------------- #
def _make_attn_kernel(*, h, scale, compute_dtype, has_mask, return_scores):
    use_approx = jnp.dtype(compute_dtype) != jnp.dtype(jnp.float32)

    def kernel(*refs):
        q_ref, kT_ref, v_ref, rk_ref, rv_ref = refs[:5]
        pos = 5
        mask_ref = None
        if has_mask:
            mask_ref = refs[pos]
            pos += 1
        out_ref = refs[pos]
        pos += 1
        sc_ref = None
        if return_scores:
            sc_ref = refs[pos]
            pos += 1
        m_scr, l_scr, acc_scr = refs[pos:pos + 3]

        j = pl.program_id(2)
        n_kv = pl.num_programs(2)

        @pl.when(j == 0)
        def _init():
            m_scr[...] = jnp.full(m_scr.shape, -jnp.inf, m_scr.dtype)
            l_scr[...] = jnp.zeros(l_scr.shape, l_scr.dtype)
            acc_scr[...] = jnp.zeros(acc_scr.shape, acc_scr.dtype)

        rk = rk_ref[0]                               # (tq, d_k, tk) lane-dense
        rv = rv_ref[0]                               # (tq, d_k, tk) lane-dense
        if has_mask:
            # additive mask bias shared across heads: 0 keep / -1e9 masked.
            # NOTE: fully-masked rows softmax over the raw relative logits
            # instead of the reference's exact uniform distribution (harmless
            # when every row has >= 1 unmasked key).
            bias = (mask_ref[0].astype(jnp.float32) - 1.0) * jnp.float32(1e9)
        else:
            bias = None
        scale_f = jnp.float32(scale)

        # Per-head 2-D pipeline (static unroll over h): QK^T and P@V on the MXU
        # (M = tq), the q-batched relation contractions on the VPU/XLU so they
        # do not contend for the MXU push slot.
        for i in range(h):
            qi = q_ref[0, i]                         # (tq, d_k)
            kti = kT_ref[0, i]                       # (d_k, tk)  lane-dense
            vi = v_ref[0, i]                         # (tk, d_k)

            qk = jnp.dot(qi, kti, preferred_element_type=jnp.float32)
            # relation logits: sum_d q[q,d] * rk[q,d,k]  (broadcast + sublane reduce)
            qr = jnp.sum((qi[:, :, None] * rk).astype(jnp.float32), axis=1)
            s = (qk + qr) * scale_f                  # (tq, tk) f32
            if bias is not None:
                s = s + bias
            if return_scores:
                sc_ref[0, i] = s.astype(sc_ref.dtype)

            # ------------- online softmax (per-head running state) -----------
            m_prev = m_scr[:, i:i + 1]               # (tq, 1)
            m_new = jnp.maximum(m_prev, jnp.max(s, axis=-1, keepdims=True))
            alpha = jnp.exp(m_prev - m_new)
            e = jnp.exp(s - m_new)                   # (tq, tk)
            l_scr[:, i:i + 1] = (alpha * l_scr[:, i:i + 1]
                                 + jnp.sum(e, axis=-1, keepdims=True))
            m_scr[:, i:i + 1] = m_new

            p = e.astype(compute_dtype)
            pv = jnp.dot(p, vi, preferred_element_type=jnp.float32)   # (tq, d_k)
            # relation values: sum_k p[q,k] * rv[q,d,k]  (broadcast + lane reduce)
            wr = jnp.sum((p[:, None, :] * rv).astype(jnp.float32), axis=-1)
            acc_scr[i] = alpha * acc_scr[i] + pv + wr                 # full slab

        # --------------- finalize: one lane-dense (tq, d_model) store ---------
        @pl.when(j == n_kv - 1)
        def _finalize():
            inv_l = pl.reciprocal(l_scr[...], approx=use_approx)      # (tq, h)
            parts = [acc_scr[i] * inv_l[:, i:i + 1] for i in range(h)]
            out_ref[0] = jnp.concatenate(parts, axis=-1).astype(out_ref.dtype)

    return kernel


# --------------------------- tile / VMEM selection -------------------------- #
def _attn_vmem_bytes(tq, tk, h, d_k, cd, has_mask, return_scores):
    d_model = h * d_k
    blk = _block_bytes(h, tq, d_k, cd)               # q (resident per q-tile)
    blk += _block_bytes(h, d_k, tk, cd)              # k^T tile
    blk += _block_bytes(h, tk, d_k, cd)              # v tile
    blk += 2 * _block_bytes(tq, d_k, tk, cd)         # rel_k^T / rel_v^T tiles
    if has_mask:
        blk += _block_bytes(1, tq, tk, jnp.bfloat16)
    blk += _block_bytes(1, tq, d_model, cd)          # output block
    if return_scores:
        blk += _block_bytes(h, tq, tk, jnp.float32)
    total = 2 * blk                                  # double-buffered pipeline
    total += 2 * _block_bytes(1, tq, h, jnp.float32)      # m / l scratch
    total += _block_bytes(h, tq, d_k, jnp.float32)        # accumulator scratch
    total += 2 * _block_bytes(tq, d_k, tk, jnp.float32)   # VPU-reduce temps
    return total


def _tile_options(n, lane):
    if lane:    # last (lane) block dim: must be a multiple of 128 or full
        cands = [c for c in (256, 128) if c <= n and n % c == 0]
    else:       # sublane block dim: multiple of 8 or full
        cands = [c for c in (256, 128, 64, 32, 16, 8) if c <= n and n % c == 0]
    cands.append(n)
    out, seen = [], set()
    for c in cands:
        if c not in seen:
            seen.add(c)
            out.append(c)
    return out


def _select_tiles(S_q, S_k, h, d_k, cd, budget, has_mask, return_scores,
                  q_block=None, kv_block=None):
    tq_opts = _tile_options(S_q, lane=False)
    tk_opts = _tile_options(S_k, lane=True)
    if (q_block is not None and S_q % q_block == 0
            and (q_block % 8 == 0 or q_block == S_q)):
        tq_opts = [q_block]
    if (kv_block is not None and S_k % kv_block == 0
            and (kv_block % 128 == 0 or kv_block == S_k)):
        tk_opts = [kv_block]
    for tq in tq_opts:
        for tk in tk_opts:
            if _attn_vmem_bytes(tq, tk, h, d_k, cd, has_mask,
                                return_scores) <= budget:
                return tq, tk
    # TODO(synk): ragged / non-divisible sequence lengths fall back to full-dim
    # tiles; proper handling needs wrapper-side padding or pl.BoundedSlice.
    return tq_opts[-1], tk_opts[-1]


# ------------------------------ attention wrapper --------------------------- #
def pallas_attention_with_relations(q4, kT4, v4, rkT, rvT, mask, *, scale,
                                    out_dtype, return_scores=False,
                                    q_block=None, kv_block=None):
    """q4: (B,h,Sq,dk); kT4: (B,h,dk,Sk); v4: (B,h,Sk,dk);
    rkT/rvT: (B,Sq,dk,Sk) lane-dense; mask: (B,Sq,Sk) 0/1 bf16 or None."""
    B, h, S_q, d_k = q4.shape
    S_k = v4.shape[2]
    d_model = h * d_k
    cd = q4.dtype
    has_mask = mask is not None

    budget = _vmem_budget()
    tq, tk = _select_tiles(S_q, S_k, h, d_k, cd, budget, has_mask,
                           return_scores, q_block, kv_block)
    n_q, n_kv = S_q // tq, S_k // tk

    kernel = _make_attn_kernel(h=h, scale=scale, compute_dtype=cd,
                               has_mask=has_mask, return_scores=return_scores)

    in_specs = [
        pl.BlockSpec((1, h, tq, d_k), lambda b, qi, j: (b, 0, qi, 0)),   # q
        pl.BlockSpec((1, h, d_k, tk), lambda b, qi, j: (b, 0, 0, j)),    # k^T
        pl.BlockSpec((1, h, tk, d_k), lambda b, qi, j: (b, 0, j, 0)),    # v
        pl.BlockSpec((1, tq, d_k, tk), lambda b, qi, j: (b, qi, 0, j)),  # rel_k^T
        pl.BlockSpec((1, tq, d_k, tk), lambda b, qi, j: (b, qi, 0, j)),  # rel_v^T
    ]
    inputs = [q4, kT4, v4, rkT, rvT]
    if has_mask:
        in_specs.append(pl.BlockSpec((1, tq, tk), lambda b, qi, j: (b, qi, j)))
        inputs.append(mask)

    out_specs = [pl.BlockSpec((1, tq, d_model), lambda b, qi, j: (b, qi, 0))]
    out_shapes = [jax.ShapeDtypeStruct((B, S_q, d_model), out_dtype)]
    if return_scores:
        out_specs.append(
            pl.BlockSpec((1, h, tq, tk), lambda b, qi, j: (b, 0, qi, j)))
        out_shapes.append(jax.ShapeDtypeStruct((B, h, S_q, S_k), jnp.float32))

    scratch_shapes = [
        pltpu.VMEM((tq, h), jnp.float32),         # running max
        pltpu.VMEM((tq, h), jnp.float32),         # running denominator
        pltpu.VMEM((h, tq, d_k), jnp.float32),    # per-head output accumulator
    ]

    est = _attn_vmem_bytes(tq, tk, h, d_k, cd, has_mask, return_scores)
    vmem_limit = int(min(budget, max(est + (8 << 20), 32 << 20)))

    # TODO(synk): if profiling shows exposed DMA on the rel streams, switch their
    # BlockSpecs to pipeline_mode=pl.Buffered(3) (VMEM permitting).
    return pl.pallas_call(
        kernel,
        grid=(B, n_q, n_kv),
        in_specs=in_specs,
        out_specs=out_specs if return_scores else out_specs[0],
        out_shape=out_shapes if return_scores else out_shapes[0],
        scratch_shapes=scratch_shapes,
        compiler_params=pltpu.CompilerParams(
            dimension_semantics=("parallel", "parallel", "arbitrary"),
            vmem_limit_bytes=vmem_limit),
    )(*inputs)


# ------------------------------- module wrapper ------------------------------ #
class MultiHeadedAttentionWithRelationsPallas:
    def __init__(self, h, d_model, key, dropout=0.1,
                 compute_dtype=jnp.bfloat16, store_attn=False,
                 q_block_size=None, kv_block_size=None):
        assert d_model % h == 0
        self.d_k = d_model // h
        self.h = h
        self.d_model = d_model
        self.compute_dtype = compute_dtype
        self.store_attn = store_attn
        self.q_block_size = q_block_size
        self.kv_block_size = kv_block_size
        # Deterministic synthetic parameters (PyTorch nn.Linear layout:
        # W (out, in), b (out,)), kept in f32 for the reference implementation.
        keys = jax.random.split(key, 8)
        bound = 1.0 / math.sqrt(d_model)
        self.weights, self.biases = [], []
        for i in range(4):
            w = jax.random.uniform(keys[2 * i], (d_model, d_model),
                                   jnp.float32, -bound, bound)
            b = jax.random.uniform(keys[2 * i + 1], (d_model,),
                                   jnp.float32, -bound, bound)
            self.weights.append(w)
            self.biases.append(b)
        # Pre-transposed projection weights, cast ONCE to the compute dtype
        # (bf16 halves resident weight VMEM and doubles MXU rate); biases stay
        # f32 and are added to the f32 accumulator.
        self.w_t = [w.T.astype(compute_dtype) for w in self.weights]
        self.wqkv_t = jnp.concatenate(self.w_t[:3], axis=1)        # (d, 3d)
        self.bqkv = jnp.concatenate(self.biases[:3], axis=0)       # (3d,)
        self.wo_t = self.w_t[3]
        self.attn = None
        # TODO(synk): training-mode dropout (p=0.1) on the attention
        # probabilities is not implemented; eval-mode dropout is identity.
        # TODO(synk): on v7x evaluate fp8 (e4m3) for rel_k/rel_v and P@V.

    def __call__(self, query, key, value, relation_k, relation_v, mask=None):
        B, S_q, d_model = query.shape
        S_k = key.shape[1]
        assert d_model == self.d_model
        h, d_k, cd = self.h, self.d_k, self.compute_dtype

        if query is key and key is value:
            # fused Q/K/V projection: one matmul, activations DMA'd once
            qkv = pallas_linear(query.reshape(B * S_q, d_model),
                                self.wqkv_t, self.bqkv, out_dtype=cd)
            q = qkv[:, 0 * d_model:1 * d_model]
            k = qkv[:, 1 * d_model:2 * d_model]
            v = qkv[:, 2 * d_model:3 * d_model]
        else:
            q = pallas_linear(query.reshape(B * S_q, d_model),
                              self.w_t[0], self.biases[0], out_dtype=cd)
            k = pallas_linear(key.reshape(B * S_k, d_model),
                              self.w_t[1], self.biases[1], out_dtype=cd)
            v = pallas_linear(value.reshape(B * S_k, d_model),
                              self.w_t[2], self.biases[2], out_dtype=cd)

        # Head-major / pre-transposed layouts (one XLA copy each) so that each
        # per-head kernel operand is a clean slab and the k / rel tiles are
        # lane-dense in the kv axis (no 128/d_k lane padding in VMEM).
        q4 = q.reshape(B, S_q, h, d_k).transpose(0, 2, 1, 3)        # (B,h,Sq,dk)
        kT4 = k.reshape(B, S_k, h, d_k).transpose(0, 2, 3, 1)       # (B,h,dk,Sk)
        v4 = v.reshape(B, S_k, h, d_k).transpose(0, 2, 1, 3)        # (B,h,Sk,dk)
        rkT = jnp.swapaxes(relation_k, -1, -2).astype(cd)           # (B,Sq,dk,Sk)
        rvT = jnp.swapaxes(relation_v, -1, -2).astype(cd)
        # Raw 0/1 mask in bf16 (no (B,S,S,1) f32 bias materialized in HBM); the
        # additive -1e9 bias is built in-kernel and shared across heads.
        mask_b = None if mask is None else (mask != 0).astype(jnp.bfloat16)

        scale = 1.0 / math.sqrt(d_k)
        if self.store_attn:
            x, scores = pallas_attention_with_relations(
                q4, kT4, v4, rkT, rvT, mask_b, scale=scale, out_dtype=cd,
                return_scores=True, q_block=self.q_block_size,
                kv_block=self.kv_block_size)
            # exact probabilities, computed outside the kernel so the kv axis
            # stays tiled even in the attn-materializing mode (v7x-friendly)
            self.attn = jax.nn.softmax(scores, axis=-1)             # (B,h,Sq,Sk)
        else:
            x = pallas_attention_with_relations(
                q4, kT4, v4, rkT, rvT, mask_b, scale=scale, out_dtype=cd,
                return_scores=False, q_block=self.q_block_size,
                kv_block=self.kv_block_size)
            self.attn = None

        out = pallas_linear(x.reshape(B * S_q, d_model), self.wo_t,
                            self.biases[3], out_dtype=jnp.float32)
        return out.reshape(B, S_q, d_model)


# ------------------------------ plain-JAX reference -------------------------- #
def reference_forward(weights, biases, h, d_k, query, key_, value, rk, rv, mask):
    B = query.shape[0]

    def lin(x, i):
        return x @ weights[i].T + biases[i]

    q = lin(query, 0).reshape(B, -1, h, d_k).transpose(0, 2, 1, 3)
    k = lin(key_, 1).reshape(B, -1, h, d_k).transpose(0, 2, 1, 3)
    v = lin(value, 2).reshape(B, -1, h, d_k).transpose(0, 2, 1, 3)

    qk = jnp.einsum('bhqd,bhkd->bhqk', q, k)
    qr = jnp.einsum('bhqd,bqkd->bhqk', q, rk)
    scores = (qk + qr) / math.sqrt(d_k)
    if mask is not None:
        scores = jnp.where(mask[:, None] == 0, -1e9, scores)
    p = jax.nn.softmax(scores, axis=-1)
    wv = jnp.einsum('bhqk,bhkd->bhqd', p, v)
    wr = jnp.einsum('bhqk,bqkd->bhqd', p, rv)
    x = (wv + wr).transpose(0, 2, 1, 3).reshape(B, -1, h * d_k)
    return x @ weights[3].T + biases[3], p


def _causal_mask(B, S):
    m = (jnp.arange(S)[:, None] >= jnp.arange(S)[None, :]).astype(jnp.int32)
    return jnp.broadcast_to(m, (B, S, S))


# ------------------------------------- main ---------------------------------- #
if __name__ == "__main__":
    h, d_model = 4, 32
    d_k = d_model // h

    root = jax.random.PRNGKey(0)
    (kp, kx, kq, kk, kv_, krk, krv,
     kx2, krk2, krv2) = jax.random.split(root, 10)

    # ---------------- config A: tiny, f32, attn probabilities ---------------- #
    B, S = 2, 16
    x = jax.random.normal(kx, (B, S, d_model), jnp.float32)
    rk = jax.random.normal(krk, (B, S, S, d_k), jnp.float32)
    rv = jax.random.normal(krv, (B, S, S, d_k), jnp.float32)
    mask = _causal_mask(B, S)

    mod32 = MultiHeadedAttentionWithRelationsPallas(
        h, d_model, kp, compute_dtype=jnp.float32, store_attn=True)
    ref_out, ref_attn = reference_forward(mod32.weights, mod32.biases, h, d_k,
                                          x, x, x, rk, rv, mask)
    out_a = jax.block_until_ready(mod32(x, x, x, rk, rv, mask))
    assert out_a.shape == (B, S, d_model)
    assert jnp.allclose(out_a, ref_out, rtol=2e-3, atol=2e-3), "f32 output mismatch"
    assert mod32.attn.shape == (B, h, S, S)
    assert jnp.allclose(mod32.attn, ref_attn, rtol=2e-3, atol=2e-3), \
        "attention probabilities mismatch"

    # mask=None path
    mod32.store_attn = False
    out_nm = jax.block_until_ready(mod32(x, x, x, rk, rv, None))
    ref_nm, _ = reference_forward(mod32.weights, mod32.biases, h, d_k,
                                  x, x, x, rk, rv, None)
    assert jnp.allclose(out_nm, ref_nm, rtol=2e-3, atol=2e-3), \
        "mask=None output mismatch"

    # distinct query/key/value tensors (non-fused projection path)
    q_in = jax.random.normal(kq, (B, S, d_model), jnp.float32)
    k_in = jax.random.normal(kk, (B, S, d_model), jnp.float32)
    v_in = jax.random.normal(kv_, (B, S, d_model), jnp.float32)
    out_c = jax.block_until_ready(mod32(q_in, k_in, v_in, rk, rv, mask))
    ref_c, _ = reference_forward(mod32.weights, mod32.biases, h, d_k,
                                 q_in, k_in, v_in, rk, rv, mask)
    assert jnp.allclose(out_c, ref_c, rtol=2e-3, atol=2e-3), \
        "cross-input output mismatch"

    # ------------- config B: S=256, f32, tiled grid (B, 2, 2) --------------- #
    B2, S2 = 2, 256
    x2 = jax.random.normal(kx2, (B2, S2, d_model), jnp.float32)
    rk2 = jax.random.normal(krk2, (B2, S2, S2, d_k), jnp.float32)
    rv2 = jax.random.normal(krv2, (B2, S2, S2, d_k), jnp.float32)
    mask2 = _causal_mask(B2, S2)

    mod32b = MultiHeadedAttentionWithRelationsPallas(
        h, d_model, kp, compute_dtype=jnp.float32,
        q_block_size=128, kv_block_size=128)
    ref_b, _ = reference_forward(mod32b.weights, mod32b.biases, h, d_k,
                                 x2, x2, x2, rk2, rv2, mask2)
    out_b = jax.block_until_ready(mod32b(x2, x2, x2, rk2, rv2, mask2))
    assert jnp.allclose(out_b, ref_b, rtol=2e-3, atol=2e-3), \
        "q/kv-tiled f32 output mismatch"

    # ------------- config D: default bf16 compute dtype, tiled -------------- #
    mod_bf16 = MultiHeadedAttentionWithRelationsPallas(
        h, d_model, kp, q_block_size=128, kv_block_size=128)
    out_d = jax.block_until_ready(mod_bf16(x2, x2, x2, rk2, rv2, mask2))
    assert jnp.allclose(out_d, ref_b, rtol=1e-1, atol=1e-1), \
        "bf16 output mismatch"

    print("KERNEL_OK")
</pallas_src>

<mosaic_0001>
module attributes {stable_mosaic.version = 11 : i64} {
  func.func @_linear_kernel(%arg0: i32, %arg1: memref<32x32xf32, #tpu.memory_space<vmem>>, %arg2: memref<32x96xf32, #tpu.memory_space<vmem>>, %arg3: memref<1x96xf32, #tpu.memory_space<vmem>>, %arg4: memref<32x96xf32, #tpu.memory_space<vmem>>) attributes {dimension_semantics = [#tpu.dimension_semantics<parallel>], iteration_bounds = array<i64: 1>, scalar_prefetch = 0 : i64, scratch_operands = 0 : i64, tpu.core_type = #tpu.core_type<tc>, window_params = [{transform_indices = @transform_0, window_bounds = array<i64: 32, 32>}, {pipeline_mode = #tpu.pipeline_mode<synchronous>, transform_indices = @transform_1, window_bounds = array<i64: 32, 96>}, {pipeline_mode = #tpu.pipeline_mode<synchronous>, transform_indices = @transform_2, window_bounds = array<i64: 1, 96>}, {transform_indices = @transform_3, window_bounds = array<i64: 32, 96>}]} {
    %c0 = arith.constant 0 : index
    %c0_0 = arith.constant 0 : index
    %0 = vector.load %arg1[%c0, %c0_0] : memref<32x32xf32, #tpu.memory_space<vmem>>, vector<32x32xf32>
    %c0_1 = arith.constant 0 : index
    %c0_2 = arith.constant 0 : index
    %1 = vector.load %arg2[%c0_1, %c0_2] : memref<32x96xf32, #tpu.memory_space<vmem>>, vector<32x96xf32>
    %cst = arith.constant dense<0.000000e+00> : vector<32x96xf32>
    %2 = tpu.matmul %0, %1, %cst {dimension_numbers = #tpu.dot_dimension_numbers<[1], [0], [0], [1], [0, 0, 1, 1], [], []>} : vector<32x32xf32>, vector<32x96xf32>, vector<32x96xf32> -> vector<32x96xf32>
    %c0_3 = arith.constant 0 : index
    %c0_4 = arith.constant 0 : index
    %3 = vector.load %arg3[%c0_3, %c0_4] : memref<1x96xf32, #tpu.memory_space<vmem>>, vector<1x96xf32>
    %4 = vector.broadcast %3 : vector<1x96xf32> to vector<32x96xf32>
    %5 = arith.addf %2, %4 : vector<32x96xf32>
    %c0_5 = arith.constant 0 : index
    %c0_6 = arith.constant 0 : index
    %6 = vector.load %arg4[%c0_5, %c0_6] : memref<32x96xf32, #tpu.memory_space<vmem>>, vector<32x96xf32>
    tpu.vector_store %arg4[%c0_5, %c0_6], %5 {strides = array<i32>} : memref<32x96xf32, #tpu.memory_space<vmem>>, vector<32x96xf32>,
    return
  }
  func.func @transform_0(%arg0: i32) -> (i32, i32) {
    %c0_i32 = arith.constant 0 : i32
    %c0_i32_0 = arith.constant 0 : i32
    return %arg0, %c0_i32 : i32, i32
  }
  func.func @transform_1(%arg0: i32) -> (i32, i32) {
    %c0_i32 = arith.constant 0 : i32
    %c0_i32_0 = arith.constant 0 : i32
    %c0_i32_1 = arith.constant 0 : i32
    return %c0_i32, %c0_i32_0 : i32, i32
  }
  func.func @transform_2(%arg0: i32) -> (i32, i32) {
    %c0_i32 = arith.constant 0 : i32
    %c0_i32_0 = arith.constant 0 : i32
    %c0_i32_1 = arith.constant 0 : i32
    return %c0_i32, %c0_i32_0 : i32, i32
  }
  func.func @transform_3(%arg0: i32) -> (i32, i32) {
    %c0_i32 = arith.constant 0 : i32
    %c0_i32_0 = arith.constant 0 : i32
    return %arg0, %c0_i32 : i32, i32
  }
}

</mosaic_0001>

<bundles_post_ra>
// kernel: tpu_custom_call.1
= control target key start
LH: loop header
LB: loop body
LE: loop exit
PB: predicated region body
PF: predicated region fallthrough
CT: control target
= control target key end

     0   :  { %8 = vsyncpa [#allocation3], 0  ;;  %s276_s0 = inlined_call_operand.hbm [shape: f32[32,32], index: 0, kind: input, shape index: {}]   ;;  %s277_s1 = inlined_call_operand.hbm [shape: f32[32,96], index: 1, kind: input, shape index: {}]   ;;  %s278_s2 = inlined_call_operand.vmem [shape: f32[1,96], index: 2, kind: input, shape index: {}]   ;;  %s279_s3 = inlined_call_operand.hbm [shape: f32[32,96], index: 3, kind: output, shape index: {}]  }
   0x1   :  { %9 = vsyncpa [#allocation6], 0 }
   0x2   :  { %10 = vsyncpa [#allocation4], 0  ;;  %s15_s14 = sshll.u32 %s276_s0, 4  ;;  %s226_s15 = smov [#allocation2]   ;;  %s16_s14 = int_to_ptr.hbm [resolvable:$true] %s15_s14 }
   0x3   :  { %s17_s16 = sshll.u32 %s226_s15, 4  ;;  %s28_s19 = sshll.u32 %s277_s1, 4  ;;  %s18_s16 = int_to_ptr.vmem [resolvable:$true] %s17_s16  ;;  %s29_s19 = int_to_ptr.hbm [resolvable:$true] %s28_s19 }
   0x4   :  { %s227_s20 = smov 128   ;;  %s228_s21 = smov 8  }
   0x5   :  { %23 = dma.hbm_to_vmem [thread:$0]  %s16_s14, 512, %s18_s16, [#allocation3], %s227_s20, %s227_s20, %s228_s21  }
   0x6   :  { %s229_s22 = smov [#allocation5]  }
   0x7   :  { %s30_s23 = sshll.u32 %s229_s22, 4  ;;  %s31_s23 = int_to_ptr.vmem [resolvable:$true] %s30_s23 }
   0x8   :  { %36 = dma.hbm_to_vmem [thread:$0]  %s29_s19, 512, %s31_s23, [#allocation6], %s227_s20, %s227_s20, %s228_s21  }
   0x9   :  { %220 = dma.done.wait [#allocation3], 512  }
   0xa   :  { %221 = vsyncadd [#allocation3], 4294966784 }
   0xb   :  { %222 = dma.done.wait [#allocation6], 512  }
   0xc   :  { %223 = vsyncadd [#allocation6], 4294966784  ;;  %v54_v0 = vld [vmem:[#allocation5 + $0x18] sm:$0xff]  ;;  %v53_v1 = vld [vmem:[#allocation5 + $0x10] sm:$0xff]  ;;  %vm59_vm0 = vcmask 261120   ;;  %vm101_vm1 = vcmask 785408  }
   0xd   :  { %131 = vmatpush.msra.mxu2 %v54_v0  ;;  %132 = vmatpush.msra.mxu3 %v54_v0  ;;  %v52_v2 = vld [vmem:[#allocation5 + $0x8] sm:$0xff]  ;;  %v51_v3 = vld [vmem:[#allocation5] sm:$0xff]  ;;  %v49_v4 = vld [vmem:[#allocation2 + $0x10] sm:$0xff]  ;;  %s230_s24 = smov [#allocation7]   ;;  %s112_s28 = sshll.u32 %s279_s3, 4  ;;  %s113_s28 = int_to_ptr.hbm [resolvable:$true] %s112_s28 }
   0xe   :  { %84 = vmatpush.msra.mxu0 %v54_v0  ;;  %130 = vmatpush.msra.mxu1 %v54_v0  ;;  %v50_v5 = vld [vmem:[#allocation2 + $0x18] sm:$0xff]  ;;  %v47_v6 = vld [vmem:[#allocation2] sm:$0xff]  ;;  %v48_v7 = vld [vmem:[#allocation2 + $0x8] sm:$0xff]  ;;  %s110_s25 = sshll.u32 %s230_s24, 4  ;;  %s111_s25 = int_to_ptr.vmem [resolvable:$true] %s110_s25 }
   0xf   :  { %134 = vmatpush.msra.mxu2 %v53_v1  ;;  %135 = vmatpush.msra.mxu3 %v53_v1  ;;  %v147_v8 = vld [vmem:[%s278_s2] ss:$0 sm:$0xff] }
  0x10   :  { %85 = vmatpush.msra.mxu0 %v53_v1  ;;  %133 = vmatpush.msra.mxu1 %v53_v1 }
  0x11   :  { %137 = vmatpush.msra.mxu2 %v52_v2  ;;  %138 = vmatpush.msra.mxu3 %v52_v2 }
  0x12   :  { %86 = vmatpush.msra.mxu0 %v52_v2  ;;  %136 = vmatpush.msra.mxu1 %v52_v2 }
  0x13   :  { %140 = vmatpush.msra.mxu2 %v51_v3  ;;  %141 = vmatpush.msra.mxu3 %v51_v3 }
  0x14   :  { %128 = vmatmul.msk.f32.vlgmr.msra.gmra.mxu2 %vm59_vm0, %v49_v4  ;;  %129 = vmatmul.msk.f32.vlgmr.msra.gmra.mxu3 %vm59_vm0, %v50_v5 }
  0x15   :  { %87 = vmatpush.msra.mxu0 %v51_v3  ;;  %139 = vmatpush.msra.mxu1 %v51_v3 }
  0x16   :  { %126 = vmatmul.msk.f32.vlgmr.msra.gmra.mxu0 %vm59_vm0, %v47_v6  ;;  %127 = vmatmul.msk.f32.vlgmr.msra.gmra.mxu1 %vm59_vm0, %v48_v7 }
  0x93   :  { %v89_v9 = vpop.f32.mrf.mxu0  ;;  %v92_v10 = vpop.f32.mrf.mxu1 }
  0x94   :  { %v90_v11 = vadd.f32 %v147_v8, %v89_v9  ;;  %v93_v12 = vadd.f32 %v147_v8, %v92_v10 }
  0x96   :  { %102 = vst.msk [vmem:[#allocation7] sm:$0xff] %vm101_vm1, %v90_v11 }
  0x97   :  { %103 = vst.msk [vmem:[#allocation7 + $0x8] sm:$0xff] %vm101_vm1, %v93_v12  ;;  %v95_v13 = vpop.f32.mrf.mxu2  ;;  %v98_v14 = vpop.f32.mrf.mxu3 }
  0x98   :  { %v96_v15 = vadd.f32 %v147_v8, %v95_v13  ;;  %v99_v16 = vadd.f32 %v147_v8, %v98_v14 }
  0x9a   :  { %104 = vst.msk [vmem:[#allocation7 + $0x10] sm:$0xff] %vm101_vm1, %v96_v15 }
  0x9b   :  { %105 = vst.msk [vmem:[#allocation7 + $0x18] sm:$0xff] %vm101_vm1, %v99_v16 }
  0x9c   :  { %118 = dma.vmem_to_hbm [thread:$0]  %s111_s25, 512, %s113_s28, [#allocation4], %s227_s20, %s227_s20, %s228_s21  }
  0x9d   :  { %224 = dma.done.wait [#allocation4], 512  }
  0x9e   :  { %225 = vsyncadd [#allocation4], 4294966784 }
  0x9f   :  { %123 = vsyncpa [#allocation3], 1 }
  0xa0   :  { %124 = vsyncpa [#allocation6], 1 }
  0xa1   :  { %125 = vsyncpa [#allocation4], 1 }

</bundles_post_ra>
